<compile_context>
chip_gen: v7x
topology: tpu7x:2x2x1
jax: 0.10.0
libtpu: 0.0.40
codegen_flags: <defaults>
</compile_context>

<pallas_src>
import jax
import jax.numpy as jnp
from jax import lax
from jax.experimental import pallas as pl
from jax.experimental.pallas import tpu as pltpu


def _round_up(x: int, m: int) -> int:
    return ((x + m - 1) // m) * m


def _pick_tile(dim: int, pref: int) -> int:
    """Largest 128-multiple <= pref that divides dim (dim is a 128-multiple)."""
    t = min(pref, dim)
    t = max(128, (t // 128) * 128)
    while dim % t:
        t -= 128
    return t


def _coral_kernel(i_idx_ref, j_idx_ref,          # scalar prefetch (SMEM)
                  zt_ref, zs_ref, clt_ref, cr_ref,  # inputs (VMEM tiles)
                  out_ref,                        # output (8,128) tile
                  acc_ref):                       # f32 scratch (TI,TJ)
    p = pl.program_id(0)
    k = pl.program_id(1)

    @pl.when(k == 0)
    def _init():
        acc_ref[...] = jnp.zeros_like(acc_ref)

    # Signed-gram tile:  acc += Z^T[i-tile, k-chunk] @ Z_signed[k-chunk, j-tile]
    # Canonical (TI,TK)x(TK,TJ) contraction -> straight vmatmul, f32 accumulate.
    acc_ref[...] += lax.dot_general(
        zt_ref[...], zs_ref[...], (((1,), (0,)), ((), ())),
        preferred_element_type=jnp.float32)

    @pl.when(k == pl.num_programs(1) - 1)
    def _finalize():
        # f32 rank-1 mean correction tile: -Ns*ms(x)ms + Nt*mt(x)mt.
        corr = lax.dot_general(
            clt_ref[...], cr_ref[...], (((1,), (0,)), ((), ())),
            preferred_element_type=jnp.float32)
        diff = acc_ref[...] + corr
        partial = jnp.sum(diff * diff, keepdims=True)          # (1, 1)
        # Off-diagonal tile pairs stand in for two symmetric blocks -> weight 2.
        weight = jnp.where(i_idx_ref[p] == j_idx_ref[p],
                           jnp.float32(1.0), jnp.float32(2.0))
        val = partial * weight
        r = lax.broadcasted_iota(jnp.int32, (8, 128), 0)
        c = lax.broadcasted_iota(jnp.int32, (8, 128), 1)
        # Lane-dense output tile: partial at [0,0], zeros elsewhere.
        out_ref[...] = jnp.where((r == 0) & (c == 0), val, jnp.float32(0.0))


def coral_loss(src_feature: jax.Array, tgt_feature: jax.Array,
               *, tile_d: int = 1024, tile_k: int = 1024,
               cast_to_bf16: bool = False) -> jax.Array:
    """CORAL loss; src_feature [Ns, d], tgt_feature [Nt, d] -> scalar f32."""
    assert src_feature.ndim == 2 and tgt_feature.ndim == 2
    ns, d = src_feature.shape
    nt, d2 = tgt_feature.shape
    assert d2 == d
    n = ns + nt

    # Tiny O(N*d) column means in f32 (the O(N*d^2) gram is the kernel's job).
    ms = jnp.mean(src_feature.astype(jnp.float32), axis=0)
    mt = jnp.mean(tgt_feature.astype(jnp.float32), axis=0)

    # ---------------- Tiled geometry ----------------
    d_pad = _round_up(d, 128)
    ti = _pick_tile(d_pad, tile_d)
    # Megacore coverage: prefer >= 2 "parallel" output tiles when d allows.
    if d_pad // ti < 2 and d_pad >= 256:
        ti = _pick_tile(d_pad, d_pad // 2)
    tj = ti                                   # symmetric (triangular) schedule
    nti = d_pad // ti

    tk = min(tile_k, _round_up(n, 128))
    tk = max(128, (tk // 128) * 128)          # lane-native on the Z^T operand
    n_pad = _round_up(n, tk)
    nk = n_pad // tk

    # Upper-triangular (i <= j) pair schedule, flattened to one grid axis.
    pairs_i, pairs_j = [], []
    for i in range(nti):
        for j in range(i, nti):
            pairs_i.append(i)
            pairs_j.append(j)
    npairs = len(pairs_i)
    i_idx = jnp.asarray(pairs_i, dtype=jnp.int32)
    j_idx = jnp.asarray(pairs_j, dtype=jnp.int32)

    # ---------------- Operands ----------------
    feat_dtype = jnp.bfloat16 if cast_to_bf16 else src_feature.dtype
    z = jnp.concatenate([src_feature, tgt_feature], axis=0).astype(feat_dtype)
    zs = jnp.concatenate([src_feature, -tgt_feature], axis=0).astype(feat_dtype)
    z = jnp.pad(z, ((0, n_pad - n), (0, d_pad - d)))
    zs = jnp.pad(zs, ((0, n_pad - n), (0, d_pad - d)))
    zt = z.T                                  # (d_pad, n_pad): canonical MXU LHS

    # Rank-1 correction operands (f32, signs/scales folded in, 8 wide/tall so
    # the finalize matmul is also the canonical contraction):
    #   clt @ cr = -Ns*ms(x)ms + Nt*mt(x)mt
    sns = jnp.sqrt(jnp.float32(ns))
    snt = jnp.sqrt(jnp.float32(nt))
    clt = jnp.zeros((d_pad, 8), jnp.float32)
    clt = clt.at[:d, 0].set(sns * ms).at[:d, 1].set(snt * mt)
    cr = jnp.zeros((8, d_pad), jnp.float32)
    cr = cr.at[0, :d].set(-sns * ms).at[1, :d].set(snt * mt)

    # ---------------- VMEM budget ----------------
    itemsize = jnp.dtype(feat_dtype).itemsize
    need = (ti * tj * 4                                  # f32 accumulator
            + 2 * (ti * tk + tk * tj) * itemsize         # double-buffered Z slabs
            + 2 * (ti * 8 + 8 * tj) * 4                  # corr slabs
            + 2 * 8 * 128 * 4)                           # output tile
    try:
        phys = int(pltpu.get_tpu_info().vmem_capacity_bytes)
    except Exception:
        phys = 64 << 20                                  # conservative (v7x)
    vmem_limit = int(min(max(32 << 20, need + (8 << 20)), int(phys * 0.75)))

    out = pl.pallas_call(
        _coral_kernel,
        out_shape=jax.ShapeDtypeStruct((npairs * 8, 128), jnp.float32),
        grid_spec=pltpu.PrefetchScalarGridSpec(
            num_scalar_prefetch=2,
            grid=(npairs, nk),
            in_specs=[
                pl.BlockSpec((ti, tk), lambda p, k, ii, jj: (ii[p], k)),  # Z^T
                pl.BlockSpec((tk, tj), lambda p, k, ii, jj: (k, jj[p])),  # Z signed
                pl.BlockSpec((ti, 8), lambda p, k, ii, jj: (ii[p], 0)),   # corr L
                pl.BlockSpec((8, tj), lambda p, k, ii, jj: (0, jj[p])),   # corr R
            ],
            out_specs=pl.BlockSpec((8, 128), lambda p, k, ii, jj: (p, 0)),
            scratch_shapes=[pltpu.VMEM((ti, tj), jnp.float32)],
        ),
        compiler_params=pltpu.CompilerParams(
            dimension_semantics=("parallel", "arbitrary"),
            vmem_limit_bytes=vmem_limit),
    )(i_idx, j_idx, zt, zs, clt, cr)

    # Tiny final reduce + normalization (matches the PyTorch module exactly:
    # mean over d*d elements, then / (4 d^2)); padded regions contribute zero
    # and the doubled off-diagonal tiles reconstruct the full symmetric sum.
    dd = jnp.float32(d)
    return jnp.sum(out) / (dd * dd) / (4.0 * dd * dd)


def _coral_loss_ref(src, tgt):
    # Pure-JAX reference mirroring the PyTorch module exactly (f32).
    d = src.shape[1]
    src = src.astype(jnp.float32)
    tgt = tgt.astype(jnp.float32)
    xm = jnp.mean(src, axis=0, keepdims=True) - src
    xc = xm.T @ xm
    xmt = jnp.mean(tgt, axis=0, keepdims=True) - tgt
    xct = xmt.T @ xmt
    loss = jnp.mean((xc - xct) * (xc - xct))
    return loss / (4 * d * d)


if __name__ == "__main__":
    key = jax.random.PRNGKey(0)
    k1, k2, k3, k4, k5, k6 = jax.random.split(key, 6)

    # 1) Small smoke test (single tile pair, single k chunk).
    src = jax.random.normal(k1, (16, 32), dtype=jnp.float32)
    tgt = 0.5 * jax.random.normal(k2, (16, 32), dtype=jnp.float32) + 0.1
    loss = coral_loss(src, tgt)
    jax.block_until_ready(loss)
    ref = _coral_loss_ref(src, tgt)
    assert jnp.allclose(loss, ref, rtol=1e-3, atol=1e-8), (loss, ref)

    # 2) Multi-tile triangular schedule (6 pairs), padding in both axes, Ns != Nt.
    src2 = jax.random.normal(k3, (40, 300), dtype=jnp.float32)
    tgt2 = 0.7 * jax.random.normal(k4, (24, 300), dtype=jnp.float32) - 0.2
    loss2 = coral_loss(src2, tgt2, tile_d=128, tile_k=128)
    jax.block_until_ready(loss2)
    ref2 = _coral_loss_ref(src2, tgt2)
    assert jnp.allclose(loss2, ref2, rtol=1e-3, atol=1e-9), (loss2, ref2)

    # 3) k-axis accumulation (nk > 1) with bf16 streamed operands (MXU bf16 path).
    src3 = jax.random.normal(k5, (80, 160), dtype=jnp.bfloat16)
    tgt3 = (0.6 * jax.random.normal(k6, (80, 160)) + 0.05).astype(jnp.bfloat16)
    loss3 = coral_loss(src3, tgt3, tile_d=128, tile_k=128)
    jax.block_until_ready(loss3)
    ref3 = _coral_loss_ref(src3, tgt3)
    assert jnp.allclose(loss3, ref3, rtol=5e-2, atol=1e-9), (loss3, ref3)

    print("KERNEL_OK")
</pallas_src>

<mosaic_0001>
module attributes {stable_mosaic.version = 11 : i64} {
  func.func @_coral_kernel(%arg0: i32, %arg1: i32, %arg2: memref<1xi32, #tpu.memory_space<smem>>, %arg3: memref<1xi32, #tpu.memory_space<smem>>, %arg4: memref<128x128xf32, #tpu.memory_space<vmem>>, %arg5: memref<128x128xf32, #tpu.memory_space<vmem>>, %arg6: memref<128x8xf32, #tpu.memory_space<vmem>>, %arg7: memref<8x128xf32, #tpu.memory_space<vmem>>, %arg8: memref<8x128xf32, #tpu.memory_space<vmem>>, %arg9: memref<128x128xf32, #tpu.memory_space<vmem>>) attributes {dimension_semantics = [#tpu.dimension_semantics<parallel>, #tpu.dimension_semantics<arbitrary>], iteration_bounds = array<i64: 1, 1>, scalar_prefetch = 2 : i64, scratch_operands = 1 : i64, tpu.core_type = #tpu.core_type<tc>, window_params = [{transform_indices = @transform_0, window_bounds = array<i64: 128, 128>}, {transform_indices = @transform_1, window_bounds = array<i64: 128, 128>}, {transform_indices = @transform_2, window_bounds = array<i64: 128, 8>}, {transform_indices = @transform_3, window_bounds = array<i64: 8, 128>}, {transform_indices = @transform_4, window_bounds = array<i64: 8, 128>}]} {
    %c0_i32 = arith.constant 0 : i32
    %0 = arith.cmpi eq, %arg1, %c0_i32 : i32
    %1 = arith.extui %0 : i1 to i32
    %c0_i32_0 = arith.constant 0 : i32
    %2 = arith.cmpi ne, %1, %c0_i32_0 : i32
    scf.if %2 {
      %cst_10 = arith.constant 0.000000e+00 : f32
      %12 = vector.broadcast %cst_10 : f32 to vector<128x128xf32>
      %c0_11 = arith.constant 0 : index
      %c0_12 = arith.constant 0 : index
      %13 = vector.load %arg9[%c0_11, %c0_12] : memref<128x128xf32, #tpu.memory_space<vmem>>, vector<128x128xf32>
      tpu.vector_store %arg9[%c0_11, %c0_12], %12 {strides = array<i32>} : memref<128x128xf32, #tpu.memory_space<vmem>>, vector<128x128xf32>,
    } else {
    }
    %c0 = arith.constant 0 : index
    %c0_1 = arith.constant 0 : index
    %3 = vector.load %arg9[%c0, %c0_1] : memref<128x128xf32, #tpu.memory_space<vmem>>, vector<128x128xf32>
    %c0_2 = arith.constant 0 : index
    %c0_3 = arith.constant 0 : index
    %4 = vector.load %arg4[%c0_2, %c0_3] : memref<128x128xf32, #tpu.memory_space<vmem>>, vector<128x128xf32>
    %c0_4 = arith.constant 0 : index
    %c0_5 = arith.constant 0 : index
    %5 = vector.load %arg5[%c0_4, %c0_5] : memref<128x128xf32, #tpu.memory_space<vmem>>, vector<128x128xf32>
    %cst = arith.constant dense<0.000000e+00> : vector<128x128xf32>
    %6 = tpu.matmul %4, %5, %cst {dimension_numbers = #tpu.dot_dimension_numbers<[1], [0], [0], [1], [0, 0, 1, 1], [], []>} : vector<128x128xf32>, vector<128x128xf32>, vector<128x128xf32> -> vector<128x128xf32>
    %7 = arith.addf %3, %6 : vector<128x128xf32>
    %c0_6 = arith.constant 0 : index
    %c0_7 = arith.constant 0 : index
    %8 = vector.load %arg9[%c0_6, %c0_7] : memref<128x128xf32, #tpu.memory_space<vmem>>, vector<128x128xf32>
    tpu.vector_store %arg9[%c0_6, %c0_7], %7 {strides = array<i32>} : memref<128x128xf32, #tpu.memory_space<vmem>>, vector<128x128xf32>,
    %c0_i32_8 = arith.constant 0 : i32
    %9 = arith.cmpi eq, %arg1, %c0_i32_8 : i32
    %10 = arith.extui %9 : i1 to i32
    %c0_i32_9 = arith.constant 0 : i32
    %11 = arith.cmpi ne, %10, %c0_i32_9 : i32
    scf.if %11 {
      %c0_10 = arith.constant 0 : index
      %c0_11 = arith.constant 0 : index
      %12 = vector.load %arg6[%c0_10, %c0_11] : memref<128x8xf32, #tpu.memory_space<vmem>>, vector<128x8xf32>
      %c0_12 = arith.constant 0 : index
      %c0_13 = arith.constant 0 : index
      %13 = vector.load %arg7[%c0_12, %c0_13] : memref<8x128xf32, #tpu.memory_space<vmem>>, vector<8x128xf32>
      %cst_14 = arith.constant dense<0.000000e+00> : vector<128x128xf32>
      %14 = tpu.matmul %12, %13, %cst_14 {dimension_numbers = #tpu.dot_dimension_numbers<[1], [0], [0], [1], [0, 0, 1, 1], [], []>} : vector<128x8xf32>, vector<8x128xf32>, vector<128x128xf32> -> vector<128x128xf32>
      %c0_15 = arith.constant 0 : index
      %c0_16 = arith.constant 0 : index
      %15 = vector.load %arg9[%c0_15, %c0_16] : memref<128x128xf32, #tpu.memory_space<vmem>>, vector<128x128xf32>
      %16 = arith.addf %15, %14 : vector<128x128xf32>
      %17 = arith.mulf %16, %16 : vector<128x128xf32>
      %18 = vector.shape_cast %17 : vector<128x128xf32> to vector<1x128x128xf32>
      %cst_17 = arith.constant dense<0.000000e+00> : vector<1xf32>
      %19 = vector.multi_reduction <add>, %18, %cst_17 [1, 2] : vector<1x128x128xf32> to vector<1xf32>
      %20 = vector.shape_cast %19 : vector<1xf32> to vector<1x1x1xf32>
      %21 = vector.extract %20[0, 0, 0] : f32 from vector<1x1x1xf32>
      %22 = vector.broadcast %21 : f32 to vector<1x1xf32>
      %23 = arith.index_cast %arg0 : i32 to index
      %24 = memref.load %arg2[%23] : memref<1xi32, #tpu.memory_space<smem>>
      %25 = arith.index_cast %arg0 : i32 to index
      %26 = memref.load %arg3[%25] : memref<1xi32, #tpu.memory_space<smem>>
      %27 = arith.cmpi eq, %24, %26 : i32
      %cst_18 = arith.constant 1.000000e+00 : f32
      %cst_19 = arith.constant 2.000000e+00 : f32
      %28 = arith.select %27, %cst_18, %cst_19 : f32
      %29 = vector.broadcast %28 : f32 to vector<1x1xf32>
      %30 = arith.mulf %22, %29 : vector<1x1xf32>
      %31 = tpu.iota {dimensions = array<i32: 0>} : vector<8x128xi32>
      %32 = tpu.iota {dimensions = array<i32: 1>} : vector<8x128xi32>
      %c0_i32_20 = arith.constant 0 : i32
      %33 = vector.broadcast %c0_i32_20 : i32 to vector<8x128xi32>
      %34 = arith.cmpi eq, %31, %33 : vector<8x128xi32>
      %c0_i32_21 = arith.constant 0 : i32
      %35 = vector.broadcast %c0_i32_21 : i32 to vector<8x128xi32>
      %36 = arith.cmpi eq, %32, %35 : vector<8x128xi32>
      %37 = arith.andi %34, %36 : vector<8x128xi1>
      %cst_22 = arith.constant 0.000000e+00 : f32
      %38 = vector.shape_cast %30 : vector<1x1xf32> to vector<1x1xf32>
      %39 = vector.broadcast %38 : vector<1x1xf32> to vector<8x128xf32>
      %40 = vector.broadcast %cst_22 : f32 to vector<8x128xf32>
      %41 = arith.select %37, %39, %40 : vector<8x128xi1>, vector<8x128xf32>
      %c0_23 = arith.constant 0 : index
      %c0_24 = arith.constant 0 : index
      %42 = vector.load %arg8[%c0_23, %c0_24] : memref<8x128xf32, #tpu.memory_space<vmem>>, vector<8x128xf32>
      tpu.vector_store %arg8[%c0_23, %c0_24], %41 {strides = array<i32>} : memref<8x128xf32, #tpu.memory_space<vmem>>, vector<8x128xf32>,
    } else {
    }
    return
  }
  func.func @transform_0(%arg0: i32, %arg1: i32, %arg2: memref<1xi32, #tpu.memory_space<smem>>, %arg3: memref<1xi32, #tpu.memory_space<smem>>) -> (i32, i32) {
    %0 = arith.index_cast %arg0 : i32 to index
    %1 = memref.load %arg2[%0] : memref<1xi32, #tpu.memory_space<smem>>
    %c0_i32 = arith.constant 0 : i32
    return %1, %arg1 : i32, i32
  }
  func.func @transform_1(%arg0: i32, %arg1: i32, %arg2: memref<1xi32, #tpu.memory_space<smem>>, %arg3: memref<1xi32, #tpu.memory_space<smem>>) -> (i32, i32) {
    %0 = arith.index_cast %arg0 : i32 to index
    %1 = memref.load %arg3[%0] : memref<1xi32, #tpu.memory_space<smem>>
    %c0_i32 = arith.constant 0 : i32
    return %arg1, %1 : i32, i32
  }
  func.func @transform_2(%arg0: i32, %arg1: i32, %arg2: memref<1xi32, #tpu.memory_space<smem>>, %arg3: memref<1xi32, #tpu.memory_space<smem>>) -> (i32, i32) {
    %0 = arith.index_cast %arg0 : i32 to index
    %1 = memref.load %arg2[%0] : memref<1xi32, #tpu.memory_space<smem>>
    %c0_i32 = arith.constant 0 : i32
    %c0_i32_0 = arith.constant 0 : i32
    return %1, %c0_i32 : i32, i32
  }
  func.func @transform_3(%arg0: i32, %arg1: i32, %arg2: memref<1xi32, #tpu.memory_space<smem>>, %arg3: memref<1xi32, #tpu.memory_space<smem>>) -> (i32, i32) {
    %0 = arith.index_cast %arg0 : i32 to index
    %1 = memref.load %arg3[%0] : memref<1xi32, #tpu.memory_space<smem>>
    %c0_i32 = arith.constant 0 : i32
    %c0_i32_0 = arith.constant 0 : i32
    return %c0_i32, %1 : i32, i32
  }
  func.func @transform_4(%arg0: i32, %arg1: i32, %arg2: memref<1xi32, #tpu.memory_space<smem>>, %arg3: memref<1xi32, #tpu.memory_space<smem>>) -> (i32, i32) {
    %c0_i32 = arith.constant 0 : i32
    %c0_i32_0 = arith.constant 0 : i32
    return %arg0, %c0_i32 : i32, i32
  }
}

</mosaic_0001>

<bundles_post_ra>
// kernel: tpu_custom_call.1
= control target key start
LH: loop header
LB: loop body
LE: loop exit
PB: predicated region body
PF: predicated region fallthrough
CT: control target
= control target key end

     0   :  { %13 = vsyncpa [#allocation7], 0  ;;  %s1079_s0 = inlined_call_operand.<no memory space> [shape: s32[1], index: 0, kind: input, shape index: {}]   ;;  %s1080_s1 = inlined_call_operand.<no memory space> [shape: s32[1], index: 1, kind: input, shape index: {}]   ;;  %s1081_s2 = inlined_call_operand.vmem [shape: f32[128,128], index: 2, kind: input, shape index: {}]   ;;  %s1082_s3 = inlined_call_operand.hbm [shape: f32[128,128], index: 3, kind: input, shape index: {}]   ;;  %s1083_s4 = inlined_call_operand.vmem [shape: f32[128,8], index: 4, kind: input, shape index: {}]   ;;  %s1084_s5 = inlined_call_operand.vmem [shape: f32[8,128], index: 5, kind: input, shape index: {}]   ;;  %s1085_s6 = inlined_call_operand.hbm [shape: f32[8,128], index: 6, kind: output, shape index: {}]  }
   0x1   :  { %14 = vsyncpa [#allocation8], 0  ;;  %s683_s23 = sshll.u32 %s1080_s1, 7  ;;  %s940_s27 = smov [#allocation6]  }
   0x2   :  { %s32_s26 = scalar_lea.hbm %s1082_s3, %s683_s23  ;;  %s33_s28 = sshll.u32 %s940_s27, 4  ;;  %s34_s28 = int_to_ptr.vmem [resolvable:$true] %s33_s28 }
   0x3   :  { %s890_s29 = scalar_lea.hbm %s32_s26, 2048  ;;  %s892_s8 = scalar_lea.hbm %s1082_s3, 2048 }
   0x4   :  { %p891_p0 = scmp.ne.s32.totalorder %s32_s26, %s890_s29  ;;  %p893_p1 = scmp.lt.u32.totalorder %s32_s26, %s1082_s3 }
   0x5   :  { %p894_p2 = scmp.lt.u32.totalorder %s892_s8, %s890_s29  ;;  %p896_p4 = scmp.lt.u32.totalorder %s890_s29, %s32_s26 }
   0x7   :  { %p895_p3 = por %p894_p2, %p893_p1 }
   0x9   :  { %p897_p5 = por %p896_p4, %p895_p3 }
   0xb   :  { %p898_p6 = pnand %p897_p5, %p891_p0 }
   0xd   :  { %901 = shalt.err (!%p898_p6)
}
   0xe   :  { %s902_s11 = scalar_lea.vmem %s34_s28, 2048  ;;  %p907_p8 = scmp.lt.s32.totalorder %s34_s28, %s34_s28 }
   0xf   :  { %p903_p7 = scmp.ne.s32.totalorder %s34_s28, %s902_s11  ;;  %p908_p9 = scmp.lt.s32.totalorder %s902_s11, %s902_s11 }
  0x11   :  { %p909_p10 = por %p908_p9, %p907_p8 }
  0x13   :  { %p910_p11 = pnand %p909_p10, %p903_p7 }
  0x15   :  { %913 = shalt.err (!%p910_p11)
}
  0x16   :  { %s941_s12 = smov 128   ;;  %s942_s13 = smov 8  }
  0x17   :  { %39 = dma.hbm_to_vmem [thread:$0]  %s32_s26, 2048, %s34_s28, [#allocation7], %s941_s12, %s941_s12, %s942_s13  }
  0x18   :  { %936 = dma.done.wait [#allocation7], 2048  }
  0x19   :  { %937 = vsyncadd [#allocation7], 4294965248  ;;  %p96_p12 = scmp.lt.s32.totalorder %s1080_s1, 0  ;;  %s684_s17 = sshll.u32 %s1079_s0, 4  ;;  %v153_v0 = vld [vmem:[#allocation6] sm:$0xff]  ;;  %v154_v1 = vld [vmem:[#allocation6 + $0x8] sm:$0xff] }
  0x1a   :  { %p80_p13 = scmp.lt.s32.totalorder %s684_s17, 15  ;;  %v155_v2 = vld [vmem:[#allocation6 + $0x10] sm:$0xff]  ;;  %v836_v3 = vpack.c.bf16 %v154_v1, %v153_v0  ;;  %v156_v4 = vld [vmem:[#allocation6 + $0x18] sm:$0xff]  ;;  %v157_v6 = vld [vmem:[#allocation6 + $0x20] sm:$0xff]  ;;  %vm366_vm0 = vcmask 64512   ;;  %p635_p0 = scmp.eq.s32.totalorder %s1079_s0, %s1080_s1 }
  0x1b   :  { %s97_s20 = scalar_select %p96_p12, %s1080_s1, 0  ;;  %v840_v5 = vpack.c.bf16 %v156_v4, %v155_v2  ;;  %v158_v7 = vld [vmem:[#allocation6 + $0x28] sm:$0xff]  ;;  %v159_v9 = vld [vmem:[#allocation6 + $0x30] sm:$0xff]  ;;  %v160_v12 = vld [vmem:[#allocation6 + $0x38] sm:$0xff] }
  0x1c   :  { %s1087_s17 = smov (!%p80_p13, %s684_s17), 15  ;;  %837 = vmatprep.subr.bf16.mxu1 %v836_v3  ;;  %v844_v8 = vpack.c.bf16 %v158_v7, %v157_v6  ;;  %v848_v16 = vpack.c.bf16 %v160_v12, %v159_v9  ;;  %v161_v18 = vld [vmem:[#allocation6 + $0x40] sm:$0xff]  ;;  %v162_v19 = vld [vmem:[#allocation6 + $0x48] sm:$0xff]  ;;  %v163_v23 = vld [vmem:[#allocation6 + $0x50] sm:$0xff]  ;;  %s943_s11 = smov [#allocation9]  }
  0x1d   :  { %s688_s21 = sshll.u32 %s97_s20, 3  ;;  %s685_s22 = sshll.u32 %s1087_s17, 3  ;;  %839 = vmatpush3.bf16.msra.mxu1 %v836_v3  ;;  %v852_v21 = vpack.c.bf16 %v162_v19, %v161_v18  ;;  %v164_v24 = vld [vmem:[#allocation6 + $0x58] sm:$0xff]  ;;  %v165_v28 = vld [vmem:[#allocation6 + $0x60] sm:$0xff]  ;;  %v166_v29 = vld [vmem:[#allocation6 + $0x68] sm:$0xff] }
  0x1e   :  { %s99_s25 = scalar_lea.vmem %s1084_s5, %s688_s21  ;;  %s1006_s28 = scalar_lea.vmem %s1083_s4, %s685_s22  ;;  %841 = vmatprep.subr.bf16.mxu1 %v840_v5  ;;  %v856_v26 = vpack.c.bf16 %v164_v24, %v163_v23  ;;  %v860_v31 = vpack.c.bf16 %v166_v29, %v165_v28  ;;  %v167_v33 = vld [vmem:[#allocation6 + $0x70] sm:$0xff]  ;;  %v168_v34 = vld [vmem:[#allocation6 + $0x78] sm:$0xff] }
  0x1f   :  { %s1011_s7 = scalar_lea.vmem %s1081_s2, %s685_s22  ;;  %v365_v10 = vld [vmem:[%s99_s25] sm:$0xff]  ;;  %v350_v14 = vld [vmem:[%s1006_s28 + $0x8] sm:$0xff]  ;;  %v351_v15 = vld [vmem:[%s1006_s28 + $0x10] sm:$0xff]  ;;  %v864_v36 = vpack.c.bf16 %v168_v34, %v167_v33  ;;  %s654_s12 = sshll.u32 %s943_s11, 4  ;;  %s655_s12 = int_to_ptr.vmem [resolvable:$true] %s654_s12 }
  0x20   :  { %v349_v11 = vld [vmem:[%s1006_s28] sm:$0xff]  ;;  %810 = vmatprep.subr.mxu0 %v365_v10  ;;  %v352_v17 = vld [vmem:[%s1006_s28 + $0x18] sm:$0xff]  ;;  %v354_v22 = vld [vmem:[%s1006_s28 + $0x28] sm:$0xff]  ;;  %s636_s9 = scalar_select %p635_p0, 1.0, 2.0 }
  0x21   :  { %812 = vmatprep.mubr.msk.f32.mxu0 %vm366_vm0, %v349_v11  ;;  %v137_v13 = vld [vmem:[%s1011_s7] sm:$0xff]  ;;  %811 = vmatpush3.msra.mxu0 %v365_v10  ;;  %v355_v25 = vld [vmem:[%s1006_s28 + $0x30] sm:$0xff]  ;;  %v356_v27 = vld [vmem:[%s1006_s28 + $0x38] sm:$0xff]  ;;  %s914_s13 = scalar_lea.vmem %s655_s12, 128  ;;  %p919_p2 = scmp.lt.s32.totalorder %s655_s12, %s655_s12 }
  0x22   :  { %786 = vmatprep.mubr.f32.mxu1 %v137_v13  ;;  %843 = vmatpush3.bf16.msra.mxu1 %v840_v5  ;;  %v353_v20 = vld [vmem:[%s1006_s28 + $0x20] sm:$0xff]  ;;  %v358_v32 = vld [vmem:[%s1006_s28 + $0x48] sm:$0xff]  ;;  %v359_v35 = vld [vmem:[%s1006_s28 + $0x50] sm:$0xff]  ;;  %p915_p1 = scmp.ne.s32.totalorder %s655_s12, %s914_s13  ;;  %p920_p3 = scmp.lt.s32.totalorder %s914_s13, %s914_s13 }
  0x23   :  { %813 = vmatmul.mubr.msk.f32.vlgmr.msra.gmra.mrb[0].mxu0 %vm366_vm0, %v350_v14  ;;  %845 = vmatprep.subr.bf16.mxu1 %v844_v8  ;;  %v357_v30 = vld [vmem:[%s1006_s28 + $0x40] sm:$0xff]  ;;  %v360_v37 = vld [vmem:[%s1006_s28 + $0x58] sm:$0xff]  ;;  %v362_v39 = vld [vmem:[%s1006_s28 + $0x68] sm:$0xff] }
  0x24   :  { %815 = vmatprep.mubr.msk.f32.mxu0 %vm366_vm0, %v351_v15  ;;  %v361_v38 = vld [vmem:[%s1006_s28 + $0x60] sm:$0xff]  ;;  %v363_v40 = vld [vmem:[%s1006_s28 + $0x70] sm:$0xff]  ;;  %v138_v41 = vld [vmem:[%s1011_s7 + $0x8] sm:$0xff]  ;;  %p921_p4 = por %p920_p3, %p919_p2 }
  0x25   :  { %v139_v42 = vld [vmem:[%s1011_s7 + $0x10] sm:$0xff]  ;;  %v364_v43 = vld [vmem:[%s1006_s28 + $0x78] sm:$0xff]  ;;  %v141_v45 = vld [vmem:[%s1011_s7 + $0x20] sm:$0xff] }
  0x26   :  { %847 = vmatpush3.bf16.msra.mxu1 %v844_v8  ;;  %v140_v44 = vld [vmem:[%s1011_s7 + $0x18] sm:$0xff]  ;;  %v142_v46 = vld [vmem:[%s1011_s7 + $0x28] sm:$0xff]  ;;  %v143_v47 = vld [vmem:[%s1011_s7 + $0x30] sm:$0xff]  ;;  %p922_p5 = pnand %p921_p4, %p915_p1 }
  0x27   :  { %816 = vmatmul.mubr.msk.f32.gmra.mrb[2].mxu0 %vm366_vm0, %v352_v17  ;;  %849 = vmatprep.subr.bf16.mxu1 %v848_v16  ;;  %v144_v48 = vld [vmem:[%s1011_s7 + $0x38] sm:$0xff]  ;;  %v145_v49 = vld [vmem:[%s1011_s7 + $0x40] sm:$0xff]  ;;  %v146_v50 = vld [vmem:[%s1011_s7 + $0x48] sm:$0xff] }
  0x28   :  { %818 = vmatprep.mubr.msk.f32.mxu0 %vm366_vm0, %v353_v20  ;;  %v147_v51 = vld [vmem:[%s1011_s7 + $0x50] sm:$0xff]  ;;  %v148_v52 = vld [vmem:[%s1011_s7 + $0x58] sm:$0xff]  ;;  %v149_v53 = vld [vmem:[%s1011_s7 + $0x60] sm:$0xff] }
  0x29   :  { %v150_v54 = vld [vmem:[%s1011_s7 + $0x68] sm:$0xff]  ;;  %v151_v55 = vld [vmem:[%s1011_s7 + $0x70] sm:$0xff]  ;;  %v152_v56 = vld [vmem:[%s1011_s7 + $0x78] sm:$0xff] }
  0x2a   :  { %851 = vmatpush3.bf16.msra.mxu1 %v848_v16 }
  0x2b   :  { %819 = vmatmul.mubr.msk.f32.gmra.mrb[4].mxu0 %vm366_vm0, %v354_v22  ;;  %853 = vmatprep.subr.bf16.mxu1 %v852_v21 }
  0x2c   :  { %821 = vmatprep.mubr.msk.f32.mxu0 %vm366_vm0, %v355_v25 }
  0x2e   :  { %855 = vmatpush3.bf16.msra.mxu1 %v852_v21 }
  0x2f   :  { %822 = vmatmul.mubr.msk.f32.gmra.mrb[6].mxu0 %vm366_vm0, %v356_v27  ;;  %857 = vmatprep.subr.bf16.mxu1 %v856_v26 }
  0x30   :  { %824 = vmatprep.mubr.msk.f32.mxu0 %vm366_vm0, %v357_v30 }
  0x32   :  { %859 = vmatpush3.bf16.msra.mxu1 %v856_v26 }
  0x33   :  { %825 = vmatmul.mubr.msk.f32.gmra.mrb[8].mxu0 %vm366_vm0, %v358_v32  ;;  %861 = vmatprep.subr.bf16.mxu1 %v860_v31 }
  0x34   :  { %827 = vmatprep.mubr.msk.f32.mxu0 %vm366_vm0, %v359_v35 }
  0x36   :  { %863 = vmatpush3.bf16.msra.mxu1 %v860_v31 }
  0x37   :  { %828 = vmatmul.mubr.msk.f32.gmra.mrb[10].mxu0 %vm366_vm0, %v360_v37  ;;  %865 = vmatprep.subr.bf16.mxu1 %v864_v36 }
  0x38   :  { %830 = vmatprep.mubr.msk.f32.mxu0 %vm366_vm0, %v361_v38 }
  0x3a   :  { %867 = vmatpush3.bf16.msra.mxu1 %v864_v36 }
  0x3b   :  { %831 = vmatmul.mubr.msk.f32.gmra.mrb[12].mxu0 %vm366_vm0, %v362_v39 }
  0x3c   :  { %833 = vmatprep.mubr.msk.f32.mxu0 %vm366_vm0, %v363_v40 }
  0x3d   :  { %787 = vmatmul.mubr.f32.vlgmr.msra.gmra.mrb[0].mxu1 %v138_v41 }
  0x3e   :  { %789 = vmatprep.mubr.f32.mxu1 %v139_v42 }
  0x3f   :  { %834 = vmatmul.mubr.msk.f32.gmra.mrb[14].mxu0 %vm366_vm0, %v364_v43 }
  0x41   :  { %790 = vmatmul.mubr.f32.gmra.mrb[2].mxu1 %v140_v44 }
  0x42   :  { %792 = vmatprep.mubr.f32.mxu1 %v141_v45 }
  0x45   :  { %793 = vmatmul.mubr.f32.gmra.mrb[4].mxu1 %v142_v46 }
  0x46   :  { %795 = vmatprep.mubr.f32.mxu1 %v143_v47 }
  0x49   :  { %796 = vmatmul.mubr.f32.gmra.mrb[6].mxu1 %v144_v48 }
  0x4a   :  { %798 = vmatprep.mubr.f32.mxu1 %v145_v49 }
  0x4d   :  { %799 = vmatmul.mubr.f32.gmra.mrb[8].mxu1 %v146_v50 }
  0x4e   :  { %801 = vmatprep.mubr.f32.mxu1 %v147_v51 }
  0x51   :  { %802 = vmatmul.mubr.f32.gmra.mrb[10].mxu1 %v148_v52 }
  0x52   :  { %804 = vmatprep.mubr.f32.mxu1 %v149_v53 }
  0x55   :  { %805 = vmatmul.mubr.f32.gmra.mrb[12].mxu1 %v150_v54 }
  0x56   :  { %807 = vmatprep.mubr.f32.mxu1 %v151_v55 }
  0x59   :  { %808 = vmatmul.mubr.f32.gmra.mrb[14].mxu1 %v152_v56 }
  0xf6   :  { %v814_v57 = vpop.f32.mrb[0].mxu0 }
  0xf7   :  { %v481_v58 = vpop.f32.mrb[1].mxu0 }
  0xfa   :  { %v817_v59 = vpop.f32.mrb[2].mxu0 }
  0xfb   :  { %v491_v60 = vpop.f32.mrb[3].mxu0 }
  0xfe   :  { %v820_v61 = vpop.f32.mrb[4].mxu0 }
  0xff   :  { %v501_v62 = vpop.f32.mrb[5].mxu0 }
 0x102   :  { %v823_v63 = vpop.f32.mrb[6].mxu0 }
 0x103   :  { %v511_v0 = vpop.f32.mrb[7].mxu0 }
 0x106   :  { %v826_v1 = vpop.f32.mrb[8].mxu0 }
 0x107   :  { %v521_v2 = vpop.f32.mrb[9].mxu0 }
 0x10a   :  { %v829_v3 = vpop.f32.mrb[10].mxu0 }
 0x10b   :  { %v531_v4 = vpop.f32.mrb[11].mxu0 }
 0x10e   :  { %v832_v5 = vpop.f32.mrb[12].mxu0 }
 0x10f   :  { %v541_v6 = vpop.f32.mrb[13].mxu0 }
 0x110   :  { %v788_v7 = vpop.f32.mrb[0].mxu1 }
 0x111   :  { %v577_v8 = vadd.f32 %v814_v57, %v788_v7  ;;  %v235_v9 = vpop.f32.mrb[1].mxu1 }
 0x112   :  { %v835_v10 = vpop.f32.mrb[14].mxu0  ;;  %v576_v11 = vadd.f32 %v481_v58, %v235_v9 }
 0x113   :  { %v551_v12 = vpop.f32.mrb[15].mxu0  ;;  %v593_v13 = vmul.f32 %v577_v8, %v577_v8 }
 0x114   :  { %v592_v14 = vmul.f32 %v576_v11, %v576_v11  ;;  %v791_v15 = vpop.f32.mrb[2].mxu1 }
 0x115   :  { %v579_v16 = vadd.f32 %v817_v59, %v791_v15  ;;  %v245_v17 = vpop.f32.mrb[3].mxu1 }
 0x116   :  { %v608_v18 = vadd.f32 %v593_v13, %v592_v14  ;;  %v578_v19 = vadd.f32 %v491_v60, %v245_v17  ;;  %v639_v17 = vlaneseq }
 0x117   :  { %v595_v24 = vmul.f32 %v579_v16, %v579_v16 }
 0x118   :  { %v594_v20 = vmul.f32 %v578_v19, %v578_v19  ;;  %v794_v21 = vpop.f32.mrb[4].mxu1 }
 0x119   :  { %v581_v22 = vadd.f32 %v820_v61, %v794_v21  ;;  %v255_v23 = vpop.f32.mrb[5].mxu1 }
 0x11a   :  { %v609_v25 = vadd.f32 %v608_v18, %v594_v20  ;;  %v580_v26 = vadd.f32 %v501_v62, %v255_v23  ;;  %v637_v18 = vstv %s636_s9 }
 0x11b   :  { %v597_v32 = vmul.f32 %v581_v22, %v581_v22 }
 0x11c   :  { %v596_v27 = vmul.f32 %v580_v26, %v580_v26  ;;  %v610_v28 = vadd.f32 %v609_v25, %v595_v24  ;;  %v797_v29 = vpop.f32.mrb[6].mxu1 }
 0x11d   :  { %v583_v30 = vadd.f32 %v823_v63, %v797_v29  ;;  %v265_v31 = vpop.f32.mrb[7].mxu1 }
 0x11e   :  { %v611_v33 = vadd.f32 %v610_v28, %v596_v27  ;;  %v582_v34 = vadd.f32 %v511_v0, %v265_v31 }
 0x11f   :  { %v599_v40 = vmul.f32 %v583_v30, %v583_v30 }
 0x120   :  { %v598_v35 = vmul.f32 %v582_v34, %v582_v34  ;;  %v612_v36 = vadd.f32 %v611_v33, %v597_v32  ;;  %v800_v37 = vpop.f32.mrb[8].mxu1 }
 0x121   :  { %v585_v38 = vadd.f32 %v826_v1, %v800_v37  ;;  %v275_v39 = vpop.f32.mrb[9].mxu1 }
 0x122   :  { %v613_v41 = vadd.f32 %v612_v36, %v598_v35  ;;  %v584_v42 = vadd.f32 %v521_v2, %v275_v39 }
 0x123   :  { %v601_v48 = vmul.f32 %v585_v38, %v585_v38 }
 0x124   :  { %v600_v43 = vmul.f32 %v584_v42, %v584_v42  ;;  %v614_v44 = vadd.f32 %v613_v41, %v599_v40  ;;  %v803_v45 = vpop.f32.mrb[10].mxu1 }
 0x125   :  { %v587_v46 = vadd.f32 %v829_v3, %v803_v45  ;;  %v285_v47 = vpop.f32.mrb[11].mxu1 }
 0x126   :  { %v615_v49 = vadd.f32 %v614_v44, %v600_v43  ;;  %v586_v50 = vadd.f32 %v531_v4, %v285_v47 }
 0x127   :  { %v603_v56 = vmul.f32 %v587_v46, %v587_v46 }
 0x128   :  { %v602_v51 = vmul.f32 %v586_v50, %v586_v50  ;;  %v616_v52 = vadd.f32 %v615_v49, %v601_v48  ;;  %v806_v53 = vpop.f32.mrb[12].mxu1 }
 0x129   :  { %v589_v54 = vadd.f32 %v832_v5, %v806_v53  ;;  %v295_v55 = vpop.f32.mrb[13].mxu1 }
 0x12a   :  { %v617_v57 = vadd.f32 %v616_v52, %v602_v51  ;;  %v588_v58 = vadd.f32 %v541_v6, %v295_v55 }
 0x12b   :  { %v605_v0 = vmul.f32 %v589_v54, %v589_v54 }
 0x12c   :  { %v604_v59 = vmul.f32 %v588_v58, %v588_v58  ;;  %v618_v60 = vadd.f32 %v617_v57, %v603_v56  ;;  %v809_v61 = vpop.f32.mrb[14].mxu1 }
 0x12d   :  { %v591_v62 = vadd.f32 %v835_v10, %v809_v61  ;;  %v305_v63 = vpop.f32.mrb[15].mxu1  ;;  %v640_v10 = vshrl.u32 %v639_v17, 7 }
 0x12e   :  { %v619_v1 = vadd.f32 %v618_v60, %v604_v59  ;;  %v590_v2 = vadd.f32 %v551_v12, %v305_v63  ;;  %v642_v12 = vand.u32 127, %v639_v17 }
 0x12f   :  { %v607_v8 = vmul.f32 %v591_v62, %v591_v62  ;;  %vm643_vm1 = vcmp.eq.s32.totalorder %v640_v10, 0 }
 0x130   :  { %v606_v3 = vmul.f32 %v590_v2, %v590_v2  ;;  %v620_v7 = vadd.f32 %v619_v1, %v605_v0  ;;  %vm644_vm2 = vcmp.eq.s32.totalorder %v642_v12, 0 }
 0x131   :  { %vm645_vm3 = vmand %vm643_vm1, %vm644_vm2 }
 0x132   :  { %v621_v4 = vadd.f32 %v620_v7, %v606_v3 }
 0x134   :  { %v622_v9 = vadd.f32 %v621_v4, %v607_v8 }
 0x136   :  { %623 = vadd.xlane.f32.xlu0 %v622_v9 }
 0x1c3   :  { %v624_v11 = vpop.xlane.xlu0 %623 }
 0x1c4   :  { %v625_v5 = vrot.slane %v624_v11, 4 }
 0x1c6   :  { %v626_v13 = vadd.f32 %v625_v5, %v624_v11 }
 0x1c8   :  { %v627_v14 = vrot.slane %v626_v13, 2 }
 0x1ca   :  { %v628_v15 = vadd.f32 %v627_v14, %v626_v13 }
 0x1cc   :  { %v629_v6 = vrot.slane %v628_v15, 1 }
 0x1ce   :  { %v630_v16 = vadd.f32 %v629_v6, %v628_v15 }
 0x1d0   :  { %884 = vpush %v630_v16 }
 0x201   :  { %s885_s10 = spop %884 }
 0x202   :  { %v632_v19 = vstv %s885_s10 }
 0x203   :  { %v638_v20 = vmul.f32 %v637_v18, %v632_v19 }
 0x205   :  { %v646_v21 = vsel %vm645_vm3, %v638_v20, 0.0 }
 0x206   :  { %647 = vst [vmem:[#allocation9] sm:$0xff] %v646_v21 }
 0x207   :  { %925 = shalt.err (!%p922_p5)
}
 0x208   :  { %s926_s14 = scalar_lea.hbm %s1085_s6, 128 }
 0x209   :  { %p927_p6 = scmp.ne.s32.totalorder %s1085_s6, %s926_s14  ;;  %p930_p7 = scmp.lt.u32.totalorder %s926_s14, %s1085_s6 }
 0x20b   :  { %p932_p8 = pnand %p930_p7, %p927_p6 }
 0x20d   :  { %935 = shalt.err (!%p932_p8)
}
 0x20e   :  { %657 = dma.vmem_to_hbm [thread:$0]  %s655_s12, 128, %s1085_s6, [#allocation8]  }
 0x20f   :  { %938 = dma.done.wait [#allocation8], 128  }
 0x210   :  { %939 = vsyncadd [#allocation8], 4294967168 }
 0x211   :  { %661 = vsyncpa [#allocation7], 1 }
 0x212   :  { %662 = vsyncpa [#allocation8], 1 }

</bundles_post_ra>
